<compile_context>
chip_gen: v6e
topology: v6e:2x2x1
jax: 0.10.0
libtpu: 0.0.40
codegen_flags: <defaults>
</compile_context>

<pallas_src>
import functools

import jax
import jax.numpy as jnp
from jax import lax
from jax.experimental import pallas as pl
from jax.experimental.pallas import tpu as pltpu

_EPS = 1e-6
_LANES = 128
_SUBLANES = 8
_TARGET_BLOCK_BYTES = 4 * 1024 * 1024  # ~4 MiB of one input per grid step


def _rmse_partial_kernel(x_ref, y_ref, o_ref, *, n_elements, block_rows,
                         needs_mask):
    # Upcast in-kernel (keeps HBM traffic at the stored dtype width).
    x = x_ref[...].astype(jnp.float32)
    y = y_ref[...].astype(jnp.float32)
    d = x - y
    dd = d * d

    if needs_mask:
        # Zero out host tail-pad and Pallas out-of-bounds block padding.
        t = pl.program_id(0)
        row = lax.broadcasted_iota(jnp.int32, dd.shape, 0) + t * block_rows
        lane = lax.broadcasted_iota(jnp.int32, dd.shape, 1)
        elem = row * _LANES + lane
        dd = jnp.where(elem < n_elements, dd, jnp.float32(0.0))

    # Reduce the block onto an (8, 128) vreg-shaped partial sum.  The reshape
    # is (8, 128)-tile aligned, so this lowers to pure VPU vreg adds (no XLU).
    o_ref[...] = jnp.sum(
        dd.reshape(block_rows // _SUBLANES, _SUBLANES, _LANES), axis=0)


def rmse_loss(x: jax.Array, y: jax.Array) -> jax.Array:
    """sqrt(mean((x - y)^2) + 1e-6), main reduction in a Pallas TPU kernel."""
    assert x.shape == y.shape, "x and y must have identical shapes"
    n_elements = x.size

    # Flatten in native dtype.  Only pad the (tiny) tail to a multiple of 128
    # so the array can be viewed as (rows, 128).
    xf = x.reshape(-1)
    yf = y.reshape(-1)
    rem = n_elements % _LANES
    if rem:
        pad = _LANES - rem
        xf = jnp.pad(xf, (0, pad))
        yf = jnp.pad(yf, (0, pad))

    rows = xf.shape[0] // _LANES
    x2d = xf.reshape(rows, _LANES)
    y2d = yf.reshape(rows, _LANES)

    # Block size: ~4 MiB per input block in the *stored* dtype, rounded to a
    # multiple of 8 sublanes, clamped to the (row-rounded) problem size.
    itemsize = jnp.dtype(x.dtype).itemsize
    target_rows = max(_SUBLANES, _TARGET_BLOCK_BYTES // (_LANES * itemsize))
    target_rows = (target_rows // _SUBLANES) * _SUBLANES
    rows_r8 = ((rows + _SUBLANES - 1) // _SUBLANES) * _SUBLANES
    block_rows = min(target_rows, rows_r8)
    tiles = (rows + block_rows - 1) // block_rows
    # Masking is only required if the grid covers more elements than exist
    # (ragged last block and/or tail pad).
    needs_mask = (tiles * block_rows * _LANES) != n_elements

    kernel = functools.partial(
        _rmse_partial_kernel,
        n_elements=n_elements,
        block_rows=block_rows,
        needs_mask=needs_mask,
    )

    partials = pl.pallas_call(
        kernel,
        out_shape=jax.ShapeDtypeStruct((tiles, _SUBLANES, _LANES), jnp.float32),
        grid=(tiles,),
        in_specs=[
            pl.BlockSpec((block_rows, _LANES), lambda t: (t, 0)),
            pl.BlockSpec((block_rows, _LANES), lambda t: (t, 0)),
        ],
        out_specs=pl.BlockSpec((None, _SUBLANES, _LANES), lambda t: (t, 0, 0)),
        compiler_params=pltpu.CompilerParams(
            dimension_semantics=("parallel",),   # shards tiles across TCs on v7x
            vmem_limit_bytes=32 * 1024 * 1024,
        ),
    )(x2d, y2d)

    # Trivial epilogue: combine the tiny per-tile partial sums.
    mse = jnp.sum(partials) / jnp.float32(n_elements)
    return jnp.sqrt(mse + jnp.float32(_EPS))


if __name__ == "__main__":
    key = jax.random.PRNGKey(0)
    kx, ky = jax.random.split(key)
    x = jax.random.normal(kx, (2, 4, 16, 16), dtype=jnp.float32)
    y = jax.random.normal(ky, (2, 4, 16, 16), dtype=jnp.float32)

    loss = rmse_loss(x, y)
    jax.block_until_ready(loss)

    # Reference check in plain JAX.
    ref = jnp.sqrt(jnp.mean((x - y) ** 2) + _EPS)
    assert jnp.allclose(loss, ref, rtol=1e-5, atol=1e-6), (loss, ref)

    print("KERNEL_OK")
</pallas_src>

<mosaic_0001>
module attributes {stable_mosaic.version = 11 : i64} {
  func.func @_rmse_partial_kernel(%arg0: i32, %arg1: memref<16x128xf32, #tpu.memory_space<vmem>>, %arg2: memref<16x128xf32, #tpu.memory_space<vmem>>, %arg3: memref<1x8x128xf32, #tpu.memory_space<vmem>>) attributes {dimension_semantics = [#tpu.dimension_semantics<parallel>], iteration_bounds = array<i64: 1>, scalar_prefetch = 0 : i64, scratch_operands = 0 : i64, tpu.core_type = #tpu.core_type<tc>, window_params = [{transform_indices = @transform_0, window_bounds = array<i64: 16, 128>}, {transform_indices = @transform_1, window_bounds = array<i64: 16, 128>}, {transform_indices = @transform_2, window_bounds = array<i64: 1, 8, 128>}]} {
    %c0 = arith.constant 0 : index
    %c0_0 = arith.constant 0 : index
    %0 = vector.load %arg1[%c0, %c0_0] : memref<16x128xf32, #tpu.memory_space<vmem>>, vector<16x128xf32>
    %c0_1 = arith.constant 0 : index
    %c0_2 = arith.constant 0 : index
    %1 = vector.load %arg2[%c0_1, %c0_2] : memref<16x128xf32, #tpu.memory_space<vmem>>, vector<16x128xf32>
    %2 = arith.subf %0, %1 : vector<16x128xf32>
    %3 = arith.mulf %2, %2 : vector<16x128xf32>
    %4 = vector.shape_cast %3 : vector<16x128xf32> to vector<2x8x128xf32>
    %cst = arith.constant dense<0.000000e+00> : vector<8x128xf32>
    %5 = vector.multi_reduction <add>, %4, %cst [0] : vector<2x8x128xf32> to vector<8x128xf32>
    %c0_3 = arith.constant 0 : index
    %c0_4 = arith.constant 0 : index
    %c0_5 = arith.constant 0 : index
    %6 = vector.load %arg3[%c0_3, %c0_4, %c0_5] : memref<1x8x128xf32, #tpu.memory_space<vmem>>, vector<1x8x128xf32>
    %7 = vector.shape_cast %6 : vector<1x8x128xf32> to vector<8x128xf32>
    %8 = vector.shape_cast %5 : vector<8x128xf32> to vector<1x8x128xf32>
    tpu.vector_store %arg3[%c0_3, %c0_4, %c0_5], %8 {strides = array<i32>} : memref<1x8x128xf32, #tpu.memory_space<vmem>>, vector<1x8x128xf32>,
    return
  }
  func.func @transform_0(%arg0: i32) -> (i32, i32) {
    %c0_i32 = arith.constant 0 : i32
    %c0_i32_0 = arith.constant 0 : i32
    return %arg0, %c0_i32 : i32, i32
  }
  func.func @transform_1(%arg0: i32) -> (i32, i32) {
    %c0_i32 = arith.constant 0 : i32
    %c0_i32_0 = arith.constant 0 : i32
    return %arg0, %c0_i32 : i32, i32
  }
  func.func @transform_2(%arg0: i32) -> (i32, i32, i32) {
    %c0_i32 = arith.constant 0 : i32
    %c0_i32_0 = arith.constant 0 : i32
    %c0_i32_1 = arith.constant 0 : i32
    return %arg0, %c0_i32, %c0_i32_0 : i32, i32, i32
  }
}

</mosaic_0001>

<bundles_post_ra>
// kernel: tpu_custom_call.1
= control target key start
LH: loop header
LB: loop body
LE: loop exit
PB: predicated region body
PF: predicated region fallthrough
CT: control target
= control target key end

     0   :  { %7 = vsyncpa [#allocation3], 0  ;;  %s166_s0 = inlined_call_operand.hbm [shape: f32[16,128], index: 0, kind: input, shape index: {}]   ;;  %s167_s1 = inlined_call_operand.hbm [shape: f32[16,128], index: 1, kind: input, shape index: {}]   ;;  %s168_s2 = inlined_call_operand.hbm [shape: f32[1,8,128], index: 2, kind: output, shape index: {}]  }
   0x1   :  { %8 = vsyncpa [#allocation6], 0 }
   0x2   :  { %9 = vsyncpa [#allocation4], 0  ;;  %s137_s9 = smov [#allocation2]  }
   0x3   :  { %s15_s10 = sshll.u32 %s137_s9, 4  ;;  %s16_s10 = int_to_ptr.vmem [resolvable:$true] %s15_s10 }
   0x4   :  { %s79_s11 = scalar_lea.vmem %s16_s10, 256  ;;  %p84_p1 = scmp.lt.s32.totalorder %s16_s10, %s16_s10 }
   0x5   :  { %p80_p0 = scmp.ne.s32.totalorder %s16_s10, %s79_s11  ;;  %p85_p2 = scmp.lt.s32.totalorder %s79_s11, %s79_s11 }
   0x7   :  { %p86_p3 = por %p85_p2, %p84_p1 }
   0x9   :  { %p87_p4 = pnand %p86_p3, %p80_p0 }
   0xb   :  { %90 = shalt.err (!%p87_p4)
}
   0xc   :  { %s138_s12 = smov 128   ;;  %s139_s13 = smov 8  }
   0xd   :  { %21 = dma.hbm_to_vmem [thread:$0]  %s166_s0, 256, %s16_s10, [#allocation3], %s138_s12, %s138_s12, %s139_s13  }
   0xe   :  { %s140_s16 = smov [#allocation5]  }
   0xf   :  { %s27_s17 = sshll.u32 %s140_s16, 4  ;;  %s28_s17 = int_to_ptr.vmem [resolvable:$true] %s27_s17 }
  0x10   :  { %s99_s18 = scalar_lea.vmem %s28_s17, 256  ;;  %p104_p6 = scmp.lt.s32.totalorder %s28_s17, %s28_s17 }
  0x11   :  { %p100_p5 = scmp.ne.s32.totalorder %s28_s17, %s99_s18  ;;  %p105_p7 = scmp.lt.s32.totalorder %s99_s18, %s99_s18 }
  0x13   :  { %p106_p8 = por %p105_p7, %p104_p6 }
  0x15   :  { %p107_p9 = pnand %p106_p8, %p100_p5 }
  0x17   :  { %110 = shalt.err (!%p107_p9)
}
  0x18   :  { %33 = dma.hbm_to_vmem [thread:$0]  %s167_s1, 256, %s28_s17, [#allocation6], %s138_s12, %s138_s12, %s139_s13  }
  0x19   :  { %131 = dma.done.wait [#allocation3], 256  }
  0x1a   :  { %132 = vsyncadd [#allocation3], 4294967040 }
  0x1b   :  { %133 = dma.done.wait [#allocation6], 256  }
  0x1c   :  { %134 = vsyncadd [#allocation6], 4294967040  ;;  %v40_v0 = vld [vmem:[#allocation2] sm:$0xff]  ;;  %v41_v1 = vld [vmem:[#allocation2 + $0x8] sm:$0xff]  ;;  %s141_s0 = smov [#allocation7]  }
  0x1d   :  { %v42_v2 = vld [vmem:[#allocation5] sm:$0xff]  ;;  %v43_v3 = vld [vmem:[#allocation5 + $0x8] sm:$0xff]  ;;  %s56_s21 = sshll.u32 %s141_s0, 4  ;;  %s57_s21 = int_to_ptr.vmem [resolvable:$true] %s56_s21 }
  0x1e   :  { %v44_v4 = vsub.f32 %v40_v0, %v42_v2  ;;  %v45_v5 = vsub.f32 %v41_v1, %v43_v3  ;;  %s111_s22 = scalar_lea.vmem %s57_s21, 128  ;;  %p116_p11 = scmp.lt.s32.totalorder %s57_s21, %s57_s21 }
  0x1f   :  { %p112_p10 = scmp.ne.s32.totalorder %s57_s21, %s111_s22  ;;  %p117_p12 = scmp.lt.s32.totalorder %s111_s22, %s111_s22 }
  0x20   :  { %v46_v6 = vmul.f32 %v44_v4, %v44_v4  ;;  %v47_v7 = vmul.f32 %v45_v5, %v45_v5 }
  0x21   :  { %p118_p13 = por %p117_p12, %p116_p11 }
  0x22   :  { %v48_v8 = vadd.f32 %v47_v7, %v46_v6 }
  0x23   :  { %p119_p0 = pnand %p118_p13, %p112_p10 }
  0x24   :  { %49 = vst [vmem:[#allocation7] sm:$0xff] %v48_v8 }
  0x25   :  { %122 = shalt.err (!%p119_p0)
}
  0x26   :  { %59 = dma.vmem_to_hbm [thread:$0]  %s57_s21, 128, %s168_s2, [#allocation4]  }
  0x27   :  { %135 = dma.done.wait [#allocation4], 128  }
  0x28   :  { %136 = vsyncadd [#allocation4], 4294967168 }
  0x29   :  { %63 = vsyncpa [#allocation3], 1 }
  0x2a   :  { %64 = vsyncpa [#allocation6], 1 }
  0x2b   :  { %65 = vsyncpa [#allocation4], 1 }

</bundles_post_ra>
